<compile_context>
chip_gen: v7x
topology: tpu7x:2x2x1
jax: 0.10.0
libtpu: 0.0.40
codegen_flags: <defaults>
</compile_context>

<pallas_src>
import functools

import jax
import jax.numpy as jnp
from jax import lax
from jax.experimental import pallas as pl
from jax.experimental.pallas import tpu as pltpu


_LANE = 128       # lane width (for conservative VMEM budgeting only)
_SUBLANE = 8      # f32 sublane packing
_MAX_TILE_B = 1024


def _round_up(x, m):
    return (x + m - 1) // m * m


def _default_vmem_budget_bytes():
    # ~75% of physical VMEM: ~96 MiB on v5e/v6e (128 MiB), ~48 MiB on v7x (64 MiB).
    try:
        cap = int(pltpu.get_tpu_info().vmem_capacity_bytes)
    except Exception:
        cap = 64 * 1024 * 1024
    return min((cap * 3) // 4, 100 * 1024 * 1024)


def _loss_wrapper_kernel(x_ref, t_ref, w_ref, b_ref, out_ref, *,
                         tile_b, batch, num_blocks):
    # model_out = x @ W^T + b  (torch.nn.Linear); f32 accumulation on the MXU.
    y = jnp.dot(x_ref[...], w_ref[...], preferred_element_type=jnp.float32)
    y = y + b_ref[...].astype(jnp.float32)            # (tile_b, D_OUT) + (1, D_OUT)

    diff = y - t_ref[...].astype(jnp.float32)
    sq = diff * diff

    def _fold(v):
        # Sublane-group fold to an (8, D_OUT) partial sum: pure VPU adds on a
        # layout-preserving reshape (no full-tile accumulator RMW, no XLU).
        if tile_b == _SUBLANE:
            return v
        return v.reshape(tile_b // _SUBLANE, _SUBLANE, -1).sum(axis=0)

    if batch % tile_b == 0:
        # Every block is full -> no row mask anywhere on the hot path.
        out_ref[...] = _fold(sq)
    else:
        i = pl.program_id(0)

        @pl.when(i < num_blocks - 1)
        def _full_block():
            out_ref[...] = _fold(sq)

        @pl.when(i == num_blocks - 1)
        def _partial_block():
            # The last block reads past the end of x / targets: those rows are
            # unspecified (possibly NaN/Inf).  jnp.where is select-based, so
            # the garbage never propagates into the loss.
            valid = batch - (num_blocks - 1) * tile_b
            row = lax.broadcasted_iota(jnp.int32, sq.shape, 0)
            out_ref[...] = _fold(jnp.where(row < valid, sq, 0.0))


def loss_wrapper_forward(x, weight_t, bias, targets, *, tile_b=None,
                         vmem_budget_bytes=None, cast_to_bf16=False):
    """Fused LossWrapper.forward: MSELoss(Linear(x), targets) -> scalar f32.

    Args:
      x:        (B, D_IN)     float32
      weight_t: (D_IN, D_OUT) float32  -- transpose of torch Linear weight
      bias:     (D_OUT,) or (1, D_OUT) float32
      targets:  (B, D_OUT)    float32
    """
    b, d_in = x.shape
    d_out = weight_t.shape[1]
    bias = bias.reshape(1, d_out)

    if cast_to_bf16:
        # Halves streamed HBM bytes and the resident weight footprint; the MXU
        # still accumulates in f32 via preferred_element_type.
        x = x.astype(jnp.bfloat16)
        targets = targets.astype(jnp.bfloat16)
        weight_t = weight_t.astype(jnp.bfloat16)
        bias = bias.astype(jnp.bfloat16)

    # Tiny batches only: present at least one full sublane group.  Never
    # triggers for b >= 8, so the streamed tensors are NOT copied/padded.
    b_rows = b
    if b < _SUBLANE:
        pad = _SUBLANE - b
        x = jnp.pad(x, ((0, pad), (0, 0)))
        targets = jnp.pad(targets, ((0, pad), (0, 0)))
        b_rows = _SUBLANE

    itemsize = jnp.dtype(x.dtype).itemsize
    # Conservative VMEM accounting uses lane/sublane-padded physical extents.
    d_in_v = _round_up(d_in, _LANE)
    d_out_v = _round_up(d_out, _LANE)

    def _vmem_bytes(tb):
        x_tile = tb * d_in_v * itemsize
        t_tile = tb * d_out_v * itemsize
        out_tile = _SUBLANE * d_out_v * 4
        resident = (d_in_v * d_out_v + _SUBLANE * d_out_v) * itemsize  # W + bias
        # Streamed tiles, output block and (by default) the resident operands
        # are double-buffered by the Pallas pipeline.
        return 2 * (x_tile + t_tile + out_tile + resident)
        # TODO(synk): single-buffer the constant-index weight/bias
        # (pipeline_mode=pl.Buffered(1)) and add an N (d_out) grid axis so very
        # large layers fit v7x's 64 MiB VMEM instead of requiring residency.

    if vmem_budget_bytes is None:
        vmem_budget_bytes = _default_vmem_budget_bytes()
    usable = vmem_budget_bytes - (2 << 20)          # headroom for internal scratch

    if _vmem_bytes(_SUBLANE) > usable:
        raise ValueError(
            "Linear layer too large to keep resident in VMEM for this fused "
            "kernel; an N-tiled (d_out) variant is required.")

    if tile_b is None:
        max_tile = min(_MAX_TILE_B, (b_rows // _SUBLANE) * _SUBLANE)
        t_max = _SUBLANE
        for cand in range(_SUBLANE, max_tile + 1, _SUBLANE):
            if _vmem_bytes(cand) <= usable:
                t_max = cand
        # Balance the tile over cdiv(b, t_max) blocks so awkward batch sizes
        # (e.g. 520) don't spend up to a whole tile on out-of-bounds rows.
        nb = pl.cdiv(b_rows, t_max)
        tile_b = _round_up(pl.cdiv(b_rows, nb), _SUBLANE)
    else:
        tile_b = _round_up(max(int(tile_b), 1), _SUBLANE)
        tile_b = min(tile_b, (b_rows // _SUBLANE) * _SUBLANE)

    num_blocks = pl.cdiv(b_rows, tile_b)
    inv_n = 1.0 / float(b * d_out)                  # true (unpadded) element count

    kernel = functools.partial(
        _loss_wrapper_kernel, tile_b=tile_b, batch=b, num_blocks=num_blocks)

    cost = pl.CostEstimate(
        flops=2 * b * d_in * d_out + 4 * b * d_out,
        transcendentals=0,
        bytes_accessed=itemsize * (b * d_in + b * d_out + d_in * d_out + d_out)
        + 4 * num_blocks * _SUBLANE * d_out,
    )

    partials = pl.pallas_call(
        kernel,
        out_shape=jax.ShapeDtypeStruct((num_blocks * _SUBLANE, d_out), jnp.float32),
        grid_spec=pltpu.PrefetchScalarGridSpec(
            num_scalar_prefetch=0,
            grid=(num_blocks,),
            in_specs=[
                # Streamed, pipelined per-step tiles.  Full-extent feature dim
                # -> no wrapper-side padding / extra HBM passes over x, targets.
                pl.BlockSpec((tile_b, d_in), lambda i: (i, 0)),
                pl.BlockSpec((tile_b, d_out), lambda i: (i, 0)),
                # Resident across the whole grid (constant block index).
                pl.BlockSpec((d_in, d_out), lambda i: (0, 0)),
                pl.BlockSpec((1, d_out), lambda i: (0, 0)),
            ],
            # Per-block lane-dense partial sums: no carried accumulator, and
            # the batch axis may be sharded across both v7x TensorCores.
            out_specs=pl.BlockSpec((_SUBLANE, d_out), lambda i: (i, 0)),
        ),
        compiler_params=pltpu.CompilerParams(
            dimension_semantics=("parallel",),
            vmem_limit_bytes=int(vmem_budget_bytes),
        ),
        cost_estimate=cost,
    )(x, targets, weight_t, bias)

    # MSELoss(reduction='mean'): tiny final reduction over the partial sums.
    return jnp.sum(partials) * inv_n


if __name__ == "__main__":
    key = jax.random.PRNGKey(0)

    def make_case(k, b, d_in, d_out):
        kx, kt, kw, kb = jax.random.split(k, 4)
        x = jax.random.normal(kx, (b, d_in), dtype=jnp.float32)
        targets = jax.random.normal(kt, (b, d_out), dtype=jnp.float32)
        bound = 1.0 / (d_in ** 0.5)
        weight_t = jax.random.uniform(
            kw, (d_in, d_out), minval=-bound, maxval=bound, dtype=jnp.float32)
        bias = jax.random.uniform(
            kb, (1, d_out), minval=-bound, maxval=bound, dtype=jnp.float32)
        return x, weight_t, bias, targets

    def ref_loss(x, weight_t, bias, targets):
        y = jnp.dot(x, weight_t, precision=lax.Precision.HIGHEST) + bias
        return jnp.mean((y - targets) ** 2)

    k1, k2 = jax.random.split(key)

    # Case 1: small shapes, auto-tiled (single full block, sublane fold path).
    x, w, bias, t = make_case(k1, 16, 32, 32)
    loss = jax.block_until_ready(loss_wrapper_forward(x, w, bias, t))
    ref = ref_loss(x, w, bias, t)
    assert jnp.allclose(loss, ref, rtol=1e-4, atol=1e-5), (loss, ref)

    # Case 2: ragged batch + non-128 feature dims, forced multi-block grid so
    # the partial-last-block mask and the wrapper-side reduction are exercised.
    x, w, bias, t = make_case(k2, 20, 32, 48)
    loss = jax.block_until_ready(loss_wrapper_forward(x, w, bias, t, tile_b=8))
    ref = ref_loss(x, w, bias, t)
    assert jnp.allclose(loss, ref, rtol=1e-4, atol=1e-5), (loss, ref)

    # Case 3: optional bf16 streaming path (f32 MXU accumulation), loose tol.
    loss_bf16 = jax.block_until_ready(
        loss_wrapper_forward(x, w, bias, t, cast_to_bf16=True))
    assert jnp.allclose(loss_bf16, ref, rtol=0.1, atol=0.1), (loss_bf16, ref)

    print("KERNEL_OK")
</pallas_src>

<mosaic_0001>
module attributes {stable_mosaic.version = 11 : i64} {
  func.func @_loss_wrapper_kernel(%arg0: i32, %arg1: memref<16x32xf32, #tpu.memory_space<vmem>>, %arg2: memref<16x32xf32, #tpu.memory_space<vmem>>, %arg3: memref<32x32xf32, #tpu.memory_space<vmem>>, %arg4: memref<1x32xf32, #tpu.memory_space<vmem>>, %arg5: memref<8x32xf32, #tpu.memory_space<vmem>>) attributes {dimension_semantics = [#tpu.dimension_semantics<parallel>], iteration_bounds = array<i64: 1>, scalar_prefetch = 0 : i64, scratch_operands = 0 : i64, tpu.core_type = #tpu.core_type<tc>, window_params = [{transform_indices = @transform_0, window_bounds = array<i64: 16, 32>}, {transform_indices = @transform_1, window_bounds = array<i64: 16, 32>}, {pipeline_mode = #tpu.pipeline_mode<synchronous>, transform_indices = @transform_2, window_bounds = array<i64: 32, 32>}, {pipeline_mode = #tpu.pipeline_mode<synchronous>, transform_indices = @transform_3, window_bounds = array<i64: 1, 32>}, {transform_indices = @transform_4, window_bounds = array<i64: 8, 32>}]} {
    %c0 = arith.constant 0 : index
    %c0_0 = arith.constant 0 : index
    %0 = vector.load %arg1[%c0, %c0_0] : memref<16x32xf32, #tpu.memory_space<vmem>>, vector<16x32xf32>
    %c0_1 = arith.constant 0 : index
    %c0_2 = arith.constant 0 : index
    %1 = vector.load %arg3[%c0_1, %c0_2] : memref<32x32xf32, #tpu.memory_space<vmem>>, vector<32x32xf32>
    %cst = arith.constant dense<0.000000e+00> : vector<16x32xf32>
    %2 = tpu.matmul %0, %1, %cst {dimension_numbers = #tpu.dot_dimension_numbers<[1], [0], [0], [1], [0, 0, 1, 1], [], []>} : vector<16x32xf32>, vector<32x32xf32>, vector<16x32xf32> -> vector<16x32xf32>
    %c0_3 = arith.constant 0 : index
    %c0_4 = arith.constant 0 : index
    %3 = vector.load %arg4[%c0_3, %c0_4] : memref<1x32xf32, #tpu.memory_space<vmem>>, vector<1x32xf32>
    %4 = vector.broadcast %3 : vector<1x32xf32> to vector<16x32xf32>
    %5 = arith.addf %2, %4 : vector<16x32xf32>
    %c0_5 = arith.constant 0 : index
    %c0_6 = arith.constant 0 : index
    %6 = vector.load %arg2[%c0_5, %c0_6] : memref<16x32xf32, #tpu.memory_space<vmem>>, vector<16x32xf32>
    %7 = arith.subf %5, %6 : vector<16x32xf32>
    %8 = arith.mulf %7, %7 : vector<16x32xf32>
    %9 = vector.shape_cast %8 : vector<16x32xf32> to vector<2x8x32xf32>
    %cst_7 = arith.constant dense<0.000000e+00> : vector<8x32xf32>
    %10 = vector.multi_reduction <add>, %9, %cst_7 [0] : vector<2x8x32xf32> to vector<8x32xf32>
    %c0_8 = arith.constant 0 : index
    %c0_9 = arith.constant 0 : index
    %11 = vector.load %arg5[%c0_8, %c0_9] : memref<8x32xf32, #tpu.memory_space<vmem>>, vector<8x32xf32>
    tpu.vector_store %arg5[%c0_8, %c0_9], %10 {strides = array<i32>} : memref<8x32xf32, #tpu.memory_space<vmem>>, vector<8x32xf32>,
    return
  }
  func.func @transform_0(%arg0: i32) -> (i32, i32) {
    %c0_i32 = arith.constant 0 : i32
    %c0_i32_0 = arith.constant 0 : i32
    return %arg0, %c0_i32 : i32, i32
  }
  func.func @transform_1(%arg0: i32) -> (i32, i32) {
    %c0_i32 = arith.constant 0 : i32
    %c0_i32_0 = arith.constant 0 : i32
    return %arg0, %c0_i32 : i32, i32
  }
  func.func @transform_2(%arg0: i32) -> (i32, i32) {
    %c0_i32 = arith.constant 0 : i32
    %c0_i32_0 = arith.constant 0 : i32
    %c0_i32_1 = arith.constant 0 : i32
    return %c0_i32, %c0_i32_0 : i32, i32
  }
  func.func @transform_3(%arg0: i32) -> (i32, i32) {
    %c0_i32 = arith.constant 0 : i32
    %c0_i32_0 = arith.constant 0 : i32
    %c0_i32_1 = arith.constant 0 : i32
    return %c0_i32, %c0_i32_0 : i32, i32
  }
  func.func @transform_4(%arg0: i32) -> (i32, i32) {
    %c0_i32 = arith.constant 0 : i32
    %c0_i32_0 = arith.constant 0 : i32
    return %arg0, %c0_i32 : i32, i32
  }
}

</mosaic_0001>

<bundles_post_ra>
// kernel: tpu_custom_call.1
= control target key start
LH: loop header
LB: loop body
LE: loop exit
PB: predicated region body
PF: predicated region fallthrough
CT: control target
= control target key end

     0   :  { %9 = vsyncpa [#allocation3], 0  ;;  %s411_s0 = inlined_call_operand.hbm [shape: f32[16,32], index: 0, kind: input, shape index: {}]   ;;  %s412_s1 = inlined_call_operand.hbm [shape: f32[16,32], index: 1, kind: input, shape index: {}]   ;;  %s413_s2 = inlined_call_operand.hbm [shape: f32[32,32], index: 2, kind: input, shape index: {}]   ;;  %s414_s3 = inlined_call_operand.vmem [shape: f32[1,32], index: 3, kind: input, shape index: {}]   ;;  %s415_s4 = inlined_call_operand.hbm [shape: f32[8,32], index: 4, kind: output, shape index: {}]  }
   0x1   :  { %10 = vsyncpa [#allocation6], 0 }
   0x2   :  { %11 = vsyncpa [#allocation4], 0  ;;  %s308_s15 = smov [#allocation5]   ;;  %s309_s17 = smov [#allocation2]  }
   0x3   :  { %s29_s16 = sshll.u32 %s308_s15, 4  ;;  %s17_s18 = sshll.u32 %s309_s17, 4  ;;  %s30_s16 = int_to_ptr.vmem [resolvable:$true] %s29_s16  ;;  %s339_s18 = int_to_ptr.vmem [resolvable:$true] %s17_s18 }
   0x4   :  { %s214_s21 = scalar_lea.hbm %s412_s1, 256 }
   0x5   :  { %p215_p0 = scmp.ne.s32.totalorder %s412_s1, %s214_s21  ;;  %p218_p1 = scmp.lt.u32.totalorder %s214_s21, %s412_s1 }
   0x7   :  { %p220_p2 = pnand %p218_p1, %p215_p0 }
   0x9   :  { %223 = shalt.err (!%p220_p2)
}
   0xa   :  { %s224_s26 = scalar_lea.vmem %s30_s16, 256  ;;  %p229_p4 = scmp.lt.s32.totalorder %s30_s16, %s30_s16 }
   0xb   :  { %p225_p3 = scmp.ne.s32.totalorder %s30_s16, %s224_s26  ;;  %p230_p5 = scmp.lt.s32.totalorder %s224_s26, %s224_s26 }
   0xd   :  { %p231_p6 = por %p230_p5, %p229_p4 }
   0xf   :  { %p232_p7 = pnand %p231_p6, %p225_p3 }
  0x11   :  { %235 = shalt.err (!%p232_p7)
}
  0x12   :  { %s310_s27 = smov 128   ;;  %s311_s28 = smov 8  }
  0x13   :  { %35 = dma.hbm_to_vmem [thread:$0]  %s412_s1, 256, %s30_s16, [#allocation6], %s310_s27, %s310_s27, %s311_s28  }
  0x14   :  { %s236_s7 = scalar_lea.hbm %s411_s0, 256 }
  0x15   :  { %p237_p8 = scmp.ne.s32.totalorder %s411_s0, %s236_s7  ;;  %p240_p9 = scmp.lt.u32.totalorder %s236_s7, %s411_s0 }
  0x17   :  { %p242_p10 = pnand %p240_p9, %p237_p8 }
  0x19   :  { %245 = shalt.err (!%p242_p10)
}
  0x1a   :  { %s246_s12 = scalar_lea.vmem %s339_s18, 256  ;;  %p251_p12 = scmp.lt.s32.totalorder %s339_s18, %s339_s18 }
  0x1b   :  { %p247_p11 = scmp.ne.s32.totalorder %s339_s18, %s246_s12  ;;  %p252_p13 = scmp.lt.s32.totalorder %s246_s12, %s246_s12 }
  0x1d   :  { %p253_p0 = por %p252_p13, %p251_p12 }
  0x1f   :  { %p254_p1 = pnand %p253_p0, %p247_p11 }
  0x21   :  { %257 = shalt.err (!%p254_p1)
}
  0x22   :  { %23 = dma.hbm_to_vmem [thread:$0]  %s411_s0, 256, %s339_s18, [#allocation3], %s310_s27, %s310_s27, %s311_s28  }
  0x23   :  { %s312_s14 = smov [#allocation7]   ;;  %s258_s19 = scalar_lea.hbm %s413_s2, 512 }
  0x24   :  { %s41_s15 = sshll.u32 %s312_s14, 4  ;;  %p259_p2 = scmp.ne.s32.totalorder %s413_s2, %s258_s19  ;;  %s42_s15 = int_to_ptr.vmem [resolvable:$true] %s41_s15 }
  0x25   :  { %p262_p3 = scmp.lt.u32.totalorder %s258_s19, %s413_s2 }
  0x27   :  { %p264_p4 = pnand %p262_p3, %p259_p2 }
  0x29   :  { %267 = shalt.err (!%p264_p4)
}
  0x2a   :  { %s268_s24 = scalar_lea.vmem %s42_s15, 512  ;;  %p273_p6 = scmp.lt.s32.totalorder %s42_s15, %s42_s15 }
  0x2b   :  { %p269_p5 = scmp.ne.s32.totalorder %s42_s15, %s268_s24  ;;  %p274_p7 = scmp.lt.s32.totalorder %s268_s24, %s268_s24 }
  0x2d   :  { %p275_p8 = por %p274_p7, %p273_p6 }
  0x2f   :  { %p276_p9 = pnand %p275_p8, %p269_p5 }
  0x31   :  { %279 = shalt.err (!%p276_p9)
}
  0x32   :  { %47 = dma.hbm_to_vmem [thread:$0]  %s413_s2, 512, %s42_s15, [#allocation6], %s310_s27, %s310_s27, %s311_s28  }
  0x33   :  { %302 = dma.done.wait [#allocation3], 256  }
  0x34   :  { %303 = vsyncadd [#allocation3], 4294967040 }
  0x35   :  { %304 = dma.done.wait [#allocation6], 768  }
  0x36   :  { %305 = vsyncadd [#allocation6], 4294966528  ;;  %vm72_vm0 = vcmask 261120   ;;  %v61_v0 = vld [vmem:[#allocation7] sm:$0xff]  ;;  %v62_v1 = vld [vmem:[#allocation7 + $0x8] sm:$0xff]  ;;  %s313_s26 = smov [#allocation8]  }
  0x37   :  { %v63_v2 = vld [vmem:[#allocation7 + $0x10] sm:$0xff]  ;;  %v200_v3 = vpack.c.bf16 %v62_v1, %v61_v0  ;;  %v64_v4 = vld [vmem:[#allocation7 + $0x18] sm:$0xff]  ;;  %v59_v5 = vld [vmem:[#allocation2] sm:$0xff]  ;;  %s170_s27 = sshll.u32 %s313_s26, 4  ;;  %s171_s27 = int_to_ptr.vmem [resolvable:$true] %s170_s27 }
  0x38   :  { %v204_v6 = vpack.c.bf16 %v64_v4, %v63_v2  ;;  %197 = vmatprep.mubr.msk.f32.mxu0 %vm72_vm0, %v59_v5  ;;  %v60_v7 = vld [vmem:[#allocation2 + $0x8] sm:$0xff]  ;;  %v180_v8 = vld [vmem:[%s414_s3] ss:$0 sm:$0xff]  ;;  %v155_v10 = vld [vmem:[#allocation5 + $0x8] sm:$0xff]  ;;  %s280_s3 = scalar_lea.vmem %s171_s27, 128  ;;  %p285_p11 = scmp.lt.s32.totalorder %s171_s27, %s171_s27 }
  0x39   :  { %201 = vmatprep.subr.bf16.mxu0 %v200_v3  ;;  %v154_v13 = vld [vmem:[#allocation5] sm:$0xff]  ;;  %p281_p10 = scmp.ne.s32.totalorder %s171_s27, %s280_s3  ;;  %p286_p12 = scmp.lt.s32.totalorder %s280_s3, %s280_s3 }
  0x3a   :  { %203 = vmatpush3.bf16.msra.mxu0 %v200_v3 }
  0x3b   :  { %205 = vmatprep.subr.bf16.mxu0 %v204_v6  ;;  %p287_p13 = por %p286_p12, %p285_p11 }
  0x3d   :  { %p288_p0 = pnand %p287_p13, %p281_p10 }
  0x3e   :  { %207 = vmatpush3.bf16.msra.mxu0 %v204_v6 }
  0x41   :  { %198 = vmatmul.mubr.msk.f32.vlgmr.msra.gmra.mrb[0].mxu0 %vm72_vm0, %v60_v7 }
 0x114   :  { %v199_v9 = vpop.f32.mrb[0].mxu0 }
 0x115   :  { %v151_v11 = vadd.f32 %v199_v9, %v180_v8  ;;  %v145_v12 = vpop.f32.mrb[1].mxu0 }
 0x116   :  { %v146_v14 = vadd.f32 %v180_v8, %v145_v12 }
 0x117   :  { %v157_v15 = vsub.f32 %v151_v11, %v155_v10 }
 0x118   :  { %v156_v16 = vsub.f32 %v146_v14, %v154_v13 }
 0x119   :  { %v159_v17 = vmul.f32 %v157_v15, %v157_v15 }
 0x11a   :  { %v158_v18 = vmul.f32 %v156_v16, %v156_v16 }
 0x11b   :  { %v161_v19 = vsel %vm72_vm0, %v159_v17, 0.0 }
 0x11c   :  { %v160_v20 = vsel %vm72_vm0, %v158_v18, 0.0 }
 0x11d   :  { %v162_v21 = vadd.f32 %v161_v19, %v160_v20 }
 0x11f   :  { %163 = vst.msk [vmem:[#allocation8] sm:$0xff] %vm72_vm0, %v162_v21 }
 0x120   :  { %291 = shalt.err (!%p288_p0)
}
 0x121   :  { %s292_s30 = scalar_lea.hbm %s415_s4, 128 }
 0x122   :  { %p293_p1 = scmp.ne.s32.totalorder %s415_s4, %s292_s30  ;;  %p296_p2 = scmp.lt.u32.totalorder %s292_s30, %s415_s4 }
 0x124   :  { %p298_p3 = pnand %p296_p2, %p293_p1 }
 0x126   :  { %301 = shalt.err (!%p298_p3)
}
 0x127   :  { %173 = dma.vmem_to_hbm [thread:$0]  %s171_s27, 128, %s415_s4, [#allocation4]  }
 0x128   :  { %306 = dma.done.wait [#allocation4], 128  }
 0x129   :  { %307 = vsyncadd [#allocation4], 4294967168 }
 0x12a   :  { %177 = vsyncpa [#allocation3], 1 }
 0x12b   :  { %178 = vsyncpa [#allocation6], 1 }
 0x12c   :  { %179 = vsyncpa [#allocation4], 1 }

</bundles_post_ra>
